<compile_context>
chip_gen: v6e
topology: v6e:2x2x1
jax: 0.10.0
libtpu: 0.0.40
codegen_flags: <defaults>
</compile_context>

<pallas_src>
import functools

import jax
import jax.numpy as jnp
from jax.experimental import pallas as pl
from jax.experimental.pallas import tpu as pltpu

EPS = 1e-5  # PyTorch BatchNorm2d default


def _deconv_kernel(x1_ref, x2_ref, a_ref, wcbd_ref, bm1_ref, b0_ref, bp1_ref,
                   sel2_lc_ref, sel_cl_ref, gb_ref, o_ref, *, n_pix, rows_per_img):
    f32 = jnp.float32
    R, L = o_ref.shape
    C2 = sel_cl_ref.shape[0]

    # ---- ConvTranspose2d(k=2,s=2) fused with conv_combine (1x1): ONE MXU pass -------
    # x1 rows arrive parity-duplicated with zero-padded K halves (wrapper layout), so
    # the matmul result is already the row-interleaved (R, L) slab: no scatter matmuls,
    # no in-kernel relayout.
    y = jnp.dot(x1_ref[...], a_ref[...], preferred_element_type=f32)          # (R, L)

    # ---- skip-path 1x1 conv: block-diagonal (L, L), K = L lanes deep -----------------
    o1 = y + jnp.dot(x2_ref[...], wcbd_ref[...], preferred_element_type=f32)

    sel2_lc = sel2_lc_ref[...]     # (2L, 2C2): block-diag lanes -> channels reducer
    sel_cl = sel_cl_ref[...]       # (C2,  L): channels -> lanes broadcaster

    def batchnorm(x, gamma, beta):
        # one-pass training-mode BN: E[x], E[x^2] per channel via a single batched
        # (1,2L)@(2L,2C2) matmul; mean folded into the affine -> no centered (R, L)
        # temporary, no second pass over x.  All statistics in f32.
        sums = jnp.concatenate([jnp.sum(x, axis=0, keepdims=True),
                                jnp.sum(x * x, axis=0, keepdims=True)], axis=1)
        stats = jnp.dot(sums, sel2_lc, preferred_element_type=f32) / n_pix    # (1, 2C2)
        mu_c, ex2_c = stats[:, :C2], stats[:, C2:]
        scale_c = gamma * jax.lax.rsqrt(ex2_c - mu_c * mu_c + EPS)            # EUP rsqrt
        shift_c = beta - mu_c * scale_c
        scale_l = jnp.dot(scale_c, sel_cl, preferred_element_type=f32)        # (1, L)
        shift_l = jnp.dot(shift_c, sel_cl, preferred_element_type=f32)        # (1, L)
        return x * scale_l + shift_l

    # ---- bn1 + ReLU -------------------------------------------------------------------
    o1 = jnp.maximum(batchnorm(o1, gb_ref[0:1], gb_ref[1:2]), 0.0)

    # ---- 3x3 conv (padding=1): vertical taps via sublane roll (XLU) + boundary mask ---
    # horizontal taps + zero padding are folded into the three (L, L) band blocks.
    row = jax.lax.broadcasted_iota(jnp.int32, (R, L), 0) % rows_per_img
    up = jnp.where(row == 0, 0.0, pltpu.roll(o1, shift=1, axis=0))            # row r-1
    dn = jnp.where(row == rows_per_img - 1, 0.0,
                   pltpu.roll(o1, shift=R - 1, axis=0))                       # row r+1
    cd = bm1_ref.dtype
    o2 = (jnp.dot(up.astype(cd), bm1_ref[...], preferred_element_type=f32) +
          jnp.dot(o1.astype(cd), b0_ref[...], preferred_element_type=f32) +
          jnp.dot(dn.astype(cd), bp1_ref[...], preferred_element_type=f32))   # (R, L)

    # ---- bn2 + lane-dense store ---------------------------------------------------------
    o_ref[...] = batchnorm(o2, gb_ref[2:3], gb_ref[3:4])


def prepare_deconv_params(params, W, compute_dtype=jnp.bfloat16):
    """Build structured matmul operands ONCE (cache outside the training/inference step)."""
    wd_t, wc_t, w1_t, g1, b1, g2, b2 = params
    C1, C2 = wd_t.shape[0], wd_t.shape[1]
    Wo = 2 * W
    L = Wo * C2
    f32 = jnp.float32

    wc_mat = wc_t[:, :, 0, 0].T.astype(f32)                   # (C2_in, C2_out)

    # deconv 2x2 taps pre-folded with the 1x1 conv_combine, stacked by row parity:
    # rows [0, W*C1) hit the even-output-row copy of x1, rows [W*C1, 2*W*C1) the odd.
    def parity_weight(ki):
        acc = jnp.zeros((W * C1, L), f32)
        for kj in range(2):
            tap = wd_t[:, :, ki, kj].astype(f32) @ wc_mat      # (C1, C2)
            place = jnp.zeros((W, Wo), f32).at[
                jnp.arange(W), 2 * jnp.arange(W) + kj].set(1.0)
            acc = acc + jnp.einsum('wv,io->wivo', place, tap).reshape(W * C1, L)
        return acc
    a_stack = jnp.concatenate([parity_weight(0), parity_weight(1)], axis=0)   # (2WC1, L)

    # block-diagonal 1x1 conv_combine weight for the skip path (one pass, K = L)
    wcbd = jnp.einsum('wv,io->wivo', jnp.eye(Wo, dtype=f32), wc_mat).reshape(L, L)

    # banded 3x3 conv weight, one (L, L) block per vertical tap dh; horizontal taps +
    # zero padding folded into the band.  NOTE: keep L <= ~256 for this trick
    # (zero fraction / VMEM grow as O(L^2)); tile over Wo beyond that.
    def hband(dh):
        acc = jnp.zeros((L, L), f32)
        for dw in (-1, 0, 1):
            shift = jnp.eye(Wo, Wo, k=-dw, dtype=f32)  # [w_in,w_out]=1 iff w_in==w_out+dw
            tap = w1_t[:, :, dh + 1, dw + 1].T.astype(f32)     # (C2_in, C2_out)
            acc = acc + jnp.einsum('wv,io->wivo', shift, tap).reshape(L, L)
        return acc
    bm1, b0, bp1 = hband(-1), hband(0), hband(1)

    # lane <-> channel 0/1 selectors for per-channel BN statistics (stay f32)
    sel_cl = jnp.tile(jnp.eye(C2, dtype=f32), (1, Wo))         # (C2, L)
    sel2_lc = jnp.kron(jnp.eye(2, dtype=f32), sel_cl.T)        # (2L, 2C2) block-diag

    cast = lambda a: a.astype(compute_dtype)
    a_stack, wcbd, bm1, b0, bp1 = map(cast, (a_stack, wcbd, bm1, b0, bp1))

    gb = jnp.stack([g1, b1, g2, b2]).astype(f32)               # (4, C2): one DMA, not four
    return (a_stack, wcbd, bm1, b0, bp1, sel2_lc, sel_cl, gb)


@jax.jit
def deconv_forward(x1, x2, prepared):
    """x1: (N, C1, H, W), x2: (N, C2, 2H, 2W) -> (N, C2, 2H, 2W), NCHW float32."""
    a_stack, wcbd, bm1, b0, bp1, sel2_lc, sel_cl, gb = prepared
    N, C1, H, W = x1.shape
    C2 = x2.shape[1]
    Ho, Wo = 2 * H, 2 * W
    R, L = N * Ho, Wo * C2
    compute_dtype = a_stack.dtype

    # NCHW -> lane-dense channels-last slabs (wrapper layout plumbing only).
    # x1 rows are duplicated into even/odd parity slots with zero-padded K halves so
    # the deconv matmul writes the interleaved (R, L) slab directly (replaces the old
    # O(R^2) e0/e1 row-scatter matmuls with pure input layout).
    x1r = jnp.transpose(x1, (0, 2, 3, 1)).reshape(N * H, W * C1)
    z = jnp.zeros_like(x1r)
    x1dup = jnp.stack([jnp.concatenate([x1r, z], axis=1),
                       jnp.concatenate([z, x1r], axis=1)],
                      axis=1).reshape(R, 2 * W * C1).astype(compute_dtype)
    x2d = jnp.transpose(x2, (0, 2, 3, 1)).reshape(R, L).astype(compute_dtype)

    vmem = pl.BlockSpec(memory_space=pltpu.MemorySpace.VMEM)
    kernel = functools.partial(_deconv_kernel,
                               n_pix=float(N * Ho * Wo), rows_per_img=Ho)
    out_slab = pl.pallas_call(
        kernel,
        out_shape=jax.ShapeDtypeStruct((R, L), jnp.float32),
        in_specs=[vmem] * 10,
        out_specs=vmem,
        compiler_params=pltpu.CompilerParams(vmem_limit_bytes=32 * 1024 * 1024),
    )(x1dup, x2d, a_stack, wcbd, bm1, b0, bp1, sel2_lc, sel_cl, gb)

    return jnp.transpose(out_slab.reshape(N, Ho, Wo, C2), (0, 3, 1, 2))


def ref_forward(x1, x2, wd_t, wc_t, w1_t, g1, b1, g2, b2):
    """Pure-JAX NCHW reference mirroring the PyTorch forward (training-mode BN)."""
    N, C1, H, W = x1.shape
    C2 = wd_t.shape[1]
    # ConvTranspose2d(k=2, s=2): out[n, d, 2h+i, 2w+j] = sum_c x1[n,c,h,w] * W[c,d,i,j]
    y = jnp.einsum('nchw,cdij->ndhiwj', x1, wd_t).reshape(N, C2, 2 * H, 2 * W)
    z = y + x2
    o1 = jnp.einsum('nchw,dc->ndhw', z, wc_t[:, :, 0, 0])
    mu = o1.mean(axis=(0, 2, 3), keepdims=True)
    var = ((o1 - mu) ** 2).mean(axis=(0, 2, 3), keepdims=True)
    o1 = (o1 - mu) / jnp.sqrt(var + EPS) * g1.reshape(1, -1, 1, 1) + b1.reshape(1, -1, 1, 1)
    o1 = jnp.maximum(o1, 0.0)
    o2 = jax.lax.conv_general_dilated(o1, w1_t, window_strides=(1, 1),
                                      padding=((1, 1), (1, 1)),
                                      dimension_numbers=('NCHW', 'OIHW', 'NCHW'))
    mu2 = o2.mean(axis=(0, 2, 3), keepdims=True)
    var2 = ((o2 - mu2) ** 2).mean(axis=(0, 2, 3), keepdims=True)
    return (o2 - mu2) / jnp.sqrt(var2 + EPS) * g2.reshape(1, -1, 1, 1) + b2.reshape(1, -1, 1, 1)


if __name__ == "__main__":
    key = jax.random.PRNGKey(0)
    N, C1, C2, H, W = 2, 4, 8, 8, 8   # x1: (2,4,8,8), x2: (2,8,16,16) -> slab (32,128)
    ks = jax.random.split(key, 9)

    x1 = jax.random.normal(ks[0], (N, C1, H, W), jnp.float32)
    x2 = jax.random.normal(ks[1], (N, C2, 2 * H, 2 * W), jnp.float32)

    # deterministic synthetic parameters (PyTorch shapes)
    wd_t = 0.3 * jax.random.normal(ks[2], (C1, C2, 2, 2), jnp.float32)   # ConvTranspose2d
    wc_t = 0.3 * jax.random.normal(ks[3], (C2, C2, 1, 1), jnp.float32)   # conv_combine
    w1_t = 0.2 * jax.random.normal(ks[4], (C2, C2, 3, 3), jnp.float32)   # conv_1
    g1 = 1.0 + 0.1 * jax.random.normal(ks[5], (C2,), jnp.float32)        # bn1 gamma
    b1 = 0.1 * jax.random.normal(ks[6], (C2,), jnp.float32)              # bn1 beta
    g2 = 1.0 + 0.1 * jax.random.normal(ks[7], (C2,), jnp.float32)        # bn2 gamma
    b2 = 0.1 * jax.random.normal(ks[8], (C2,), jnp.float32)              # bn2 beta
    params = (wd_t, wc_t, w1_t, g1, b1, g2, b2)

    ref = jax.block_until_ready(ref_forward(x1, x2, *params))

    # exact-precision path: tight correctness check against the NCHW reference
    prep_f32 = jax.block_until_ready(prepare_deconv_params(params, W, compute_dtype=jnp.float32))
    out_f32 = jax.block_until_ready(deconv_forward(x1, x2, prep_f32))
    assert out_f32.shape == ref.shape == (N, C2, 2 * H, 2 * W)
    err32 = float(jnp.max(jnp.abs(out_f32 - ref)))
    assert jnp.allclose(out_f32, ref, atol=2e-3, rtol=2e-3), f"f32 max abs err {err32}"

    # default fast path: bf16 matmul operands, f32 accumulation / BN statistics
    prep = jax.block_until_ready(prepare_deconv_params(params, W))
    out = jax.block_until_ready(deconv_forward(x1, x2, prep))
    err_bf16 = float(jnp.max(jnp.abs(out - ref)))
    assert err_bf16 < 0.25, f"bf16 max abs err {err_bf16}"

    print("KERNEL_OK")
</pallas_src>

<mosaic_0001>
module attributes {stable_mosaic.version = 11 : i64} {
  func.func @_deconv_kernel(%arg0: memref<32x64xf32, #tpu.memory_space<vmem>>, %arg1: memref<32x128xf32, #tpu.memory_space<vmem>>, %arg2: memref<64x128xf32, #tpu.memory_space<vmem>>, %arg3: memref<128x128xf32, #tpu.memory_space<vmem>>, %arg4: memref<128x128xf32, #tpu.memory_space<vmem>>, %arg5: memref<128x128xf32, #tpu.memory_space<vmem>>, %arg6: memref<128x128xf32, #tpu.memory_space<vmem>>, %arg7: memref<256x16xf32, #tpu.memory_space<vmem>>, %arg8: memref<8x128xf32, #tpu.memory_space<vmem>>, %arg9: memref<4x8xf32, #tpu.memory_space<vmem>>, %arg10: memref<32x128xf32, #tpu.memory_space<vmem>>) attributes {dimension_semantics = [], scalar_prefetch = 0 : i64, scratch_operands = 0 : i64, tpu.core_type = #tpu.core_type<tc>} {
    %c0 = arith.constant 0 : index
    %c0_0 = arith.constant 0 : index
    %0 = vector.load %arg0[%c0, %c0_0] : memref<32x64xf32, #tpu.memory_space<vmem>>, vector<32x64xf32>
    %c0_1 = arith.constant 0 : index
    %c0_2 = arith.constant 0 : index
    %1 = vector.load %arg2[%c0_1, %c0_2] : memref<64x128xf32, #tpu.memory_space<vmem>>, vector<64x128xf32>
    %cst = arith.constant dense<0.000000e+00> : vector<32x128xf32>
    %2 = tpu.matmul %0, %1, %cst {dimension_numbers = #tpu.dot_dimension_numbers<[1], [0], [0], [1], [0, 0, 1, 1], [], []>} : vector<32x64xf32>, vector<64x128xf32>, vector<32x128xf32> -> vector<32x128xf32>
    %c0_3 = arith.constant 0 : index
    %c0_4 = arith.constant 0 : index
    %3 = vector.load %arg1[%c0_3, %c0_4] : memref<32x128xf32, #tpu.memory_space<vmem>>, vector<32x128xf32>
    %c0_5 = arith.constant 0 : index
    %c0_6 = arith.constant 0 : index
    %4 = vector.load %arg3[%c0_5, %c0_6] : memref<128x128xf32, #tpu.memory_space<vmem>>, vector<128x128xf32>
    %cst_7 = arith.constant dense<0.000000e+00> : vector<32x128xf32>
    %5 = tpu.matmul %3, %4, %cst_7 {dimension_numbers = #tpu.dot_dimension_numbers<[1], [0], [0], [1], [0, 0, 1, 1], [], []>} : vector<32x128xf32>, vector<128x128xf32>, vector<32x128xf32> -> vector<32x128xf32>
    %6 = arith.addf %2, %5 : vector<32x128xf32>
    %c0_8 = arith.constant 0 : index
    %c0_9 = arith.constant 0 : index
    %7 = vector.load %arg7[%c0_8, %c0_9] : memref<256x16xf32, #tpu.memory_space<vmem>>, vector<256x16xf32>
    %c0_10 = arith.constant 0 : index
    %c0_11 = arith.constant 0 : index
    %8 = vector.load %arg8[%c0_10, %c0_11] : memref<8x128xf32, #tpu.memory_space<vmem>>, vector<8x128xf32>
    %c0_12 = arith.constant 0 : index
    %c0_13 = arith.constant 0 : index
    %9 = vector.load %arg9[%c0_12, %c0_13] : memref<4x8xf32, #tpu.memory_space<vmem>>, vector<1x8xf32>
    %c1 = arith.constant 1 : index
    %c0_14 = arith.constant 0 : index
    %10 = vector.load %arg9[%c1, %c0_14] : memref<4x8xf32, #tpu.memory_space<vmem>>, vector<1x8xf32>
    %cst_15 = arith.constant dense<0.000000e+00> : vector<128xf32>
    %11 = vector.multi_reduction <add>, %6, %cst_15 [0] : vector<32x128xf32> to vector<128xf32>
    %12 = vector.shape_cast %11 : vector<128xf32> to vector<1x128xf32>
    %13 = arith.mulf %6, %6 : vector<32x128xf32>
    %cst_16 = arith.constant dense<0.000000e+00> : vector<128xf32>
    %14 = vector.multi_reduction <add>, %13, %cst_16 [0] : vector<32x128xf32> to vector<128xf32>
    %15 = vector.shape_cast %14 : vector<128xf32> to vector<1x128xf32>
    %16 = tpu.concatenate %12, %15 in 1 : vector<1x128xf32>, vector<1x128xf32> -> vector<1x256xf32>
    %cst_17 = arith.constant dense<0.000000e+00> : vector<1x16xf32>
    %17 = tpu.matmul %16, %7, %cst_17 {dimension_numbers = #tpu.dot_dimension_numbers<[1], [0], [0], [1], [0, 0, 1, 1], [], []>} : vector<1x256xf32>, vector<256x16xf32>, vector<1x16xf32> -> vector<1x16xf32>
    %cst_18 = arith.constant 5.120000e+02 : f32
    %18 = vector.broadcast %cst_18 : f32 to vector<1x16xf32>
    %19 = arith.divf %17, %18 : vector<1x16xf32>
    %20 = vector.extract_strided_slice %19 {offsets = [0, 0], sizes = [1, 8], strides = [1, 1]} : vector<1x16xf32> to vector<1x8xf32>
    %21 = vector.extract_strided_slice %19 {offsets = [0, 8], sizes = [1, 8], strides = [1, 1]} : vector<1x16xf32> to vector<1x8xf32>
    %22 = arith.mulf %20, %20 : vector<1x8xf32>
    %23 = arith.subf %21, %22 : vector<1x8xf32>
    %cst_19 = arith.constant 9.99999974E-6 : f32
    %24 = vector.broadcast %cst_19 : f32 to vector<1x8xf32>
    %25 = arith.addf %23, %24 : vector<1x8xf32>
    %26 = math.rsqrt %25 : vector<1x8xf32>
    %27 = arith.mulf %9, %26 : vector<1x8xf32>
    %28 = arith.mulf %20, %27 : vector<1x8xf32>
    %29 = arith.subf %10, %28 : vector<1x8xf32>
    %cst_20 = arith.constant dense<0.000000e+00> : vector<1x128xf32>
    %30 = tpu.matmul %27, %8, %cst_20 {dimension_numbers = #tpu.dot_dimension_numbers<[1], [0], [0], [1], [0, 0, 1, 1], [], []>} : vector<1x8xf32>, vector<8x128xf32>, vector<1x128xf32> -> vector<1x128xf32>
    %cst_21 = arith.constant dense<0.000000e+00> : vector<1x128xf32>
    %31 = tpu.matmul %29, %8, %cst_21 {dimension_numbers = #tpu.dot_dimension_numbers<[1], [0], [0], [1], [0, 0, 1, 1], [], []>} : vector<1x8xf32>, vector<8x128xf32>, vector<1x128xf32> -> vector<1x128xf32>
    %32 = vector.broadcast %30 : vector<1x128xf32> to vector<32x128xf32>
    %33 = arith.mulf %6, %32 : vector<32x128xf32>
    %34 = vector.broadcast %31 : vector<1x128xf32> to vector<32x128xf32>
    %35 = arith.addf %33, %34 : vector<32x128xf32>
    %cst_22 = arith.constant 0.000000e+00 : f32
    %36 = vector.broadcast %cst_22 : f32 to vector<32x128xf32>
    %37 = arith.maximumf %35, %36 : vector<32x128xf32>
    %38 = tpu.iota {dimensions = array<i32: 0>} : vector<32x128xi32>
    %c16_i32 = arith.constant 16 : i32
    %c0_i32 = arith.constant 0 : i32
    %39 = arith.cmpi eq, %c16_i32, %c0_i32 : i32
    %c1_i32 = arith.constant 1 : i32
    %40 = arith.select %39, %c1_i32, %c16_i32 : i32
    %41 = vector.broadcast %40 : i32 to vector<32x128xi32>
    %42 = arith.remsi %38, %41 : vector<32x128xi32>
    %c0_i32_23 = arith.constant 0 : i32
    %43 = vector.broadcast %c0_i32_23 : i32 to vector<32x128xi32>
    %44 = arith.cmpi ne, %42, %43 : vector<32x128xi32>
    %c0_i32_24 = arith.constant 0 : i32
    %45 = vector.broadcast %c0_i32_24 : i32 to vector<32x128xi32>
    %46 = arith.cmpi slt, %42, %45 : vector<32x128xi32>
    %c0_i32_25 = arith.constant 0 : i32
    %47 = arith.cmpi slt, %40, %c0_i32_25 : i32
    %48 = vector.broadcast %47 : i1 to vector<32x128xi1>
    %49 = vector.broadcast %48 : vector<32x128xi1> to vector<32x128xi1>
    %50 = arith.xori %46, %49 : vector<32x128xi1>
    %51 = arith.andi %50, %44 : vector<32x128xi1>
    %52 = vector.broadcast %40 : i32 to vector<32x128xi32>
    %53 = arith.addi %42, %52 : vector<32x128xi32>
    %54 = arith.select %51, %53, %42 : vector<32x128xi1>, vector<32x128xi32>
    %c0_i32_26 = arith.constant 0 : i32
    %55 = vector.broadcast %c0_i32_26 : i32 to vector<32x128xi32>
    %56 = arith.cmpi eq, %54, %55 : vector<32x128xi32>
    %c1_i32_27 = arith.constant 1 : i32
    %57 = tpu.dynamic_rotate %37 by %c1_i32_27 dim 0 : vector<32x128xf32>, i32 -> vector<32x128xf32>
    %cst_28 = arith.constant 0.000000e+00 : f32
    %58 = vector.broadcast %cst_28 : f32 to vector<32x128xf32>
    %59 = arith.select %56, %58, %57 : vector<32x128xi1>, vector<32x128xf32>
    %c15_i32 = arith.constant 15 : i32
    %60 = vector.broadcast %c15_i32 : i32 to vector<32x128xi32>
    %61 = arith.cmpi eq, %54, %60 : vector<32x128xi32>
    %c31_i32 = arith.constant 31 : i32
    %62 = tpu.dynamic_rotate %37 by %c31_i32 dim 0 : vector<32x128xf32>, i32 -> vector<32x128xf32>
    %cst_29 = arith.constant 0.000000e+00 : f32
    %63 = vector.broadcast %cst_29 : f32 to vector<32x128xf32>
    %64 = arith.select %61, %63, %62 : vector<32x128xi1>, vector<32x128xf32>
    %c0_30 = arith.constant 0 : index
    %c0_31 = arith.constant 0 : index
    %65 = vector.load %arg4[%c0_30, %c0_31] : memref<128x128xf32, #tpu.memory_space<vmem>>, vector<128x128xf32>
    %cst_32 = arith.constant dense<0.000000e+00> : vector<32x128xf32>
    %66 = tpu.matmul %59, %65, %cst_32 {dimension_numbers = #tpu.dot_dimension_numbers<[1], [0], [0], [1], [0, 0, 1, 1], [], []>} : vector<32x128xf32>, vector<128x128xf32>, vector<32x128xf32> -> vector<32x128xf32>
    %c0_33 = arith.constant 0 : index
    %c0_34 = arith.constant 0 : index
    %67 = vector.load %arg5[%c0_33, %c0_34] : memref<128x128xf32, #tpu.memory_space<vmem>>, vector<128x128xf32>
    %cst_35 = arith.constant dense<0.000000e+00> : vector<32x128xf32>
    %68 = tpu.matmul %37, %67, %cst_35 {dimension_numbers = #tpu.dot_dimension_numbers<[1], [0], [0], [1], [0, 0, 1, 1], [], []>} : vector<32x128xf32>, vector<128x128xf32>, vector<32x128xf32> -> vector<32x128xf32>
    %69 = arith.addf %66, %68 : vector<32x128xf32>
    %c0_36 = arith.constant 0 : index
    %c0_37 = arith.constant 0 : index
    %70 = vector.load %arg6[%c0_36, %c0_37] : memref<128x128xf32, #tpu.memory_space<vmem>>, vector<128x128xf32>
    %cst_38 = arith.constant dense<0.000000e+00> : vector<32x128xf32>
    %71 = tpu.matmul %64, %70, %cst_38 {dimension_numbers = #tpu.dot_dimension_numbers<[1], [0], [0], [1], [0, 0, 1, 1], [], []>} : vector<32x128xf32>, vector<128x128xf32>, vector<32x128xf32> -> vector<32x128xf32>
    %72 = arith.addf %69, %71 : vector<32x128xf32>
    %c2 = arith.constant 2 : index
    %c0_39 = arith.constant 0 : index
    %73 = vector.load %arg9[%c2, %c0_39] : memref<4x8xf32, #tpu.memory_space<vmem>>, vector<1x8xf32>
    %c3 = arith.constant 3 : index
    %c0_40 = arith.constant 0 : index
    %74 = vector.load %arg9[%c3, %c0_40] : memref<4x8xf32, #tpu.memory_space<vmem>>, vector<1x8xf32>
    %cst_41 = arith.constant dense<0.000000e+00> : vector<128xf32>
    %75 = vector.multi_reduction <add>, %72, %cst_41 [0] : vector<32x128xf32> to vector<128xf32>
    %76 = vector.shape_cast %75 : vector<128xf32> to vector<1x128xf32>
    %77 = arith.mulf %72, %72 : vector<32x128xf32>
    %cst_42 = arith.constant dense<0.000000e+00> : vector<128xf32>
    %78 = vector.multi_reduction <add>, %77, %cst_42 [0] : vector<32x128xf32> to vector<128xf32>
    %79 = vector.shape_cast %78 : vector<128xf32> to vector<1x128xf32>
    %80 = tpu.concatenate %76, %79 in 1 : vector<1x128xf32>, vector<1x128xf32> -> vector<1x256xf32>
    %cst_43 = arith.constant dense<0.000000e+00> : vector<1x16xf32>
    %81 = tpu.matmul %80, %7, %cst_43 {dimension_numbers = #tpu.dot_dimension_numbers<[1], [0], [0], [1], [0, 0, 1, 1], [], []>} : vector<1x256xf32>, vector<256x16xf32>, vector<1x16xf32> -> vector<1x16xf32>
    %cst_44 = arith.constant 5.120000e+02 : f32
    %82 = vector.broadcast %cst_44 : f32 to vector<1x16xf32>
    %83 = arith.divf %81, %82 : vector<1x16xf32>
    %84 = vector.extract_strided_slice %83 {offsets = [0, 0], sizes = [1, 8], strides = [1, 1]} : vector<1x16xf32> to vector<1x8xf32>
    %85 = vector.extract_strided_slice %83 {offsets = [0, 8], sizes = [1, 8], strides = [1, 1]} : vector<1x16xf32> to vector<1x8xf32>
    %86 = arith.mulf %84, %84 : vector<1x8xf32>
    %87 = arith.subf %85, %86 : vector<1x8xf32>
    %cst_45 = arith.constant 9.99999974E-6 : f32
    %88 = vector.broadcast %cst_45 : f32 to vector<1x8xf32>
    %89 = arith.addf %87, %88 : vector<1x8xf32>
    %90 = math.rsqrt %89 : vector<1x8xf32>
    %91 = arith.mulf %73, %90 : vector<1x8xf32>
    %92 = arith.mulf %84, %91 : vector<1x8xf32>
    %93 = arith.subf %74, %92 : vector<1x8xf32>
    %cst_46 = arith.constant dense<0.000000e+00> : vector<1x128xf32>
    %94 = tpu.matmul %91, %8, %cst_46 {dimension_numbers = #tpu.dot_dimension_numbers<[1], [0], [0], [1], [0, 0, 1, 1], [], []>} : vector<1x8xf32>, vector<8x128xf32>, vector<1x128xf32> -> vector<1x128xf32>
    %cst_47 = arith.constant dense<0.000000e+00> : vector<1x128xf32>
    %95 = tpu.matmul %93, %8, %cst_47 {dimension_numbers = #tpu.dot_dimension_numbers<[1], [0], [0], [1], [0, 0, 1, 1], [], []>} : vector<1x8xf32>, vector<8x128xf32>, vector<1x128xf32> -> vector<1x128xf32>
    %96 = vector.broadcast %94 : vector<1x128xf32> to vector<32x128xf32>
    %97 = arith.mulf %72, %96 : vector<32x128xf32>
    %98 = vector.broadcast %95 : vector<1x128xf32> to vector<32x128xf32>
    %99 = arith.addf %97, %98 : vector<32x128xf32>
    %c0_48 = arith.constant 0 : index
    %c0_49 = arith.constant 0 : index
    %100 = vector.load %arg10[%c0_48, %c0_49] : memref<32x128xf32, #tpu.memory_space<vmem>>, vector<32x128xf32>
    tpu.vector_store %arg10[%c0_48, %c0_49], %99 {strides = array<i32>} : memref<32x128xf32, #tpu.memory_space<vmem>>, vector<32x128xf32>,
    return
  }
}

</mosaic_0001>

<bundles_post_ra>
// kernel: deconv_forward.1
= control target key start
LH: loop header
LB: loop body
LE: loop exit
PB: predicated region body
PF: predicated region fallthrough
CT: control target
= control target key end

     0   :  { %vm152_vm0 = vcmask 523264   ;;  %vm1629_vm1 = vmmov 0   ;;  %s1630_s12 = smov 120   ;;  %vm394_vm2 = vcmask 64512   ;;  %s2290_s3 = inlined_call_operand.vmem [shape: f32[128,128], index: 3, kind: input, shape index: {}]   ;;  %s2291_s2 = inlined_call_operand.vmem [shape: f32[64,128], index: 2, kind: input, shape index: {}]   ;;  %s2292_s0 = inlined_call_operand.vmem [shape: f32[32,64], index: 0, kind: input, shape index: {}]   ;;  %s2293_s1 = inlined_call_operand.vmem [shape: f32[32,128], index: 1, kind: input, shape index: {}]   ;;  %s2294_s7 = inlined_call_operand.vmem [shape: f32[256,16], index: 7, kind: input, shape index: {}]   ;;  %s2295_s8 = inlined_call_operand.vmem [shape: f32[8,128], index: 8, kind: input, shape index: {}]   ;;  %s2296_s4 = inlined_call_operand.vmem [shape: f32[128,128], index: 4, kind: input, shape index: {}]   ;;  %s2297_s9 = inlined_call_operand.vmem [shape: f32[4,8], index: 9, kind: input, shape index: {}]   ;;  %s2298_s5 = inlined_call_operand.vmem [shape: f32[128,128], index: 5, kind: input, shape index: {}]   ;;  %s2299_s6 = inlined_call_operand.vmem [shape: f32[128,128], index: 6, kind: input, shape index: {}]   ;;  %s2300_s10 = inlined_call_operand.vmem [shape: f32[32,128], index: 10, kind: output, shape index: {}]  }
   0x1   :  { %v66_v0 = vld [vmem:[%s2290_s3 + $0x78] sm:$0xff]  ;;  %v65_v1 = vld [vmem:[%s2290_s3 + $0x70] sm:$0xff]  ;;  %v64_v2 = vld [vmem:[%s2290_s3 + $0x68] sm:$0xff] }
   0x2   :  { %1425 = vmatprep.subr.mxu0 %v66_v0  ;;  %v46_v3 = vld [vmem:[%s2291_s2 + $0x38] sm:$0xff]  ;;  %v45_v4 = vld [vmem:[%s2291_s2 + $0x30] sm:$0xff]  ;;  %v63_v5 = vld [vmem:[%s2290_s3 + $0x60] sm:$0xff] }
   0x3   :  { %1426 = vmatpush3.msra.mxu0 %v66_v0  ;;  %1463 = vmatprep.subr.mxu1 %v46_v3  ;;  %v44_v6 = vld [vmem:[%s2291_s2 + $0x28] sm:$0xff]  ;;  %v62_v7 = vld [vmem:[%s2290_s3 + $0x58] sm:$0xff]  ;;  %v43_v8 = vld [vmem:[%s2291_s2 + $0x20] sm:$0xff] }
   0x4   :  { %1427 = vmatprep.subr.mxu0 %v65_v1  ;;  %1464 = vmatpush3.msra.mxu1 %v46_v3  ;;  %v61_v9 = vld [vmem:[%s2290_s3 + $0x50] sm:$0xff]  ;;  %v42_v10 = vld [vmem:[%s2291_s2 + $0x18] sm:$0xff]  ;;  %v60_v11 = vld [vmem:[%s2290_s3 + $0x48] sm:$0xff] }
   0x5   :  { %1428 = vmatpush3.msra.mxu0 %v65_v1  ;;  %1465 = vmatprep.subr.mxu1 %v45_v4  ;;  %v41_v12 = vld [vmem:[%s2291_s2 + $0x10] sm:$0xff]  ;;  %v59_v13 = vld [vmem:[%s2290_s3 + $0x40] sm:$0xff]  ;;  %v40_v14 = vld [vmem:[%s2291_s2 + $0x8] sm:$0xff] }
   0x6   :  { %1429 = vmatprep.subr.mxu0 %v64_v2  ;;  %1466 = vmatpush3.msra.mxu1 %v45_v4  ;;  %v58_v15 = vld [vmem:[%s2290_s3 + $0x38] sm:$0xff]  ;;  %v39_v16 = vld [vmem:[%s2291_s2] sm:$0xff]  ;;  %v57_v17 = vld [vmem:[%s2290_s3 + $0x30] sm:$0xff] }
   0x7   :  { %1430 = vmatpush3.msra.mxu0 %v64_v2  ;;  %1467 = vmatprep.subr.mxu1 %v44_v6  ;;  %v35_v18 = vld [vmem:[%s2292_s0] sm:$0xff]  ;;  %v36_v19 = vld [vmem:[%s2292_s0 + $0x8] sm:$0xff]  ;;  %v37_v22 = vld [vmem:[%s2292_s0 + $0x10] sm:$0xff] }
   0x8   :  { %1431 = vmatprep.subr.mxu0 %v63_v5  ;;  %1468 = vmatpush3.msra.mxu1 %v44_v6  ;;  %v56_v20 = vld [vmem:[%s2290_s3 + $0x28] sm:$0xff]  ;;  %v47_v21 = vld [vmem:[%s2293_s1] sm:$0xff]  ;;  %v1763_v24 = vld [vmem:[%s2294_s7 + $0xf8] sm:$0xff] }
   0x9   :  { %1432 = vmatpush3.msra.mxu0 %v63_v5  ;;  %1469 = vmatprep.subr.mxu1 %v43_v8  ;;  %v55_v23 = vld [vmem:[%s2290_s3 + $0x20] sm:$0xff]  ;;  %v38_v25 = vld [vmem:[%s2292_s0 + $0x18] sm:$0xff]  ;;  %v53_v28 = vld [vmem:[%s2290_s3 + $0x10] sm:$0xff] }
   0xa   :  { %1433 = vmatprep.subr.mxu0 %v62_v7  ;;  %1470 = vmatpush3.msra.mxu1 %v43_v8  ;;  %v54_v26 = vld [vmem:[%s2290_s3 + $0x18] sm:$0xff]  ;;  %v52_v29 = vld [vmem:[%s2290_s3 + $0x8] sm:$0xff]  ;;  %v51_v30 = vld [vmem:[%s2290_s3] sm:$0xff] }
   0xb   :  { %1434 = vmatpush3.msra.mxu0 %v62_v7  ;;  %1471 = vmatprep.subr.mxu1 %v42_v10  ;;  %v1775_v27 = vld [vmem:[%s2294_s7 + $0x78] sm:$0xff]  ;;  %v48_v31 = vld [vmem:[%s2293_s1 + $0x8] sm:$0xff]  ;;  %v49_v32 = vld [vmem:[%s2293_s1 + $0x10] sm:$0xff] }
   0xc   :  { %1435 = vmatprep.subr.mxu0 %v61_v9  ;;  %1472 = vmatpush3.msra.mxu1 %v42_v10  ;;  %v50_v33 = vld [vmem:[%s2293_s1 + $0x18] sm:$0xff]  ;;  %v1801_v34 = vld [vmem:[%s2294_s7 + $0xf0] sm:$0xff]  ;;  %v1813_v36 = vld [vmem:[%s2294_s7 + $0xe8] sm:$0xff] }
   0xd   :  { %1436 = vmatpush3.msra.mxu0 %v61_v9  ;;  %1473 = vmatprep.subr.mxu1 %v41_v12  ;;  %v1806_v35 = vld [vmem:[%s2294_s7 + $0x70] sm:$0xff]  ;;  %v1819_v37 = vld [vmem:[%s2294_s7 + $0x68] sm:$0xff]  ;;  %v1825_v38 = vld [vmem:[%s2294_s7 + $0xe0] sm:$0xff] }
   0xe   :  { %1437 = vmatprep.subr.mxu0 %v60_v11  ;;  %1474 = vmatpush3.msra.mxu1 %v41_v12  ;;  %v1831_v39 = vld [vmem:[%s2294_s7 + $0x60] sm:$0xff]  ;;  %v1837_v40 = vld [vmem:[%s2294_s7 + $0xd8] sm:$0xff]  ;;  %v1849_v42 = vld [vmem:[%s2294_s7 + $0xd0] sm:$0xff] }
   0xf   :  { %1438 = vmatpush3.msra.mxu0 %v60_v11  ;;  %1475 = vmatprep.subr.mxu1 %v40_v14  ;;  %v1843_v41 = vld [vmem:[%s2294_s7 + $0x58] sm:$0xff]  ;;  %v1855_v43 = vld [vmem:[%s2294_s7 + $0x50] sm:$0xff]  ;;  %v1861_v44 = vld [vmem:[%s2294_s7 + $0xc8] sm:$0xff] }
  0x10   :  { %1439 = vmatprep.subr.mxu0 %v59_v13  ;;  %1476 = vmatpush3.msra.mxu1 %v40_v14  ;;  %v1867_v45 = vld [vmem:[%s2294_s7 + $0x48] sm:$0xff]  ;;  %v1873_v46 = vld [vmem:[%s2294_s7 + $0xc0] sm:$0xff]  ;;  %v1885_v48 = vld [vmem:[%s2294_s7 + $0xb8] sm:$0xff] }
  0x11   :  { %1440 = vmatpush3.msra.mxu0 %v59_v13  ;;  %1477 = vmatprep.subr.mxu1 %v39_v16  ;;  %v1879_v47 = vld [vmem:[%s2294_s7 + $0x40] sm:$0xff]  ;;  %v1891_v49 = vld [vmem:[%s2294_s7 + $0x38] sm:$0xff]  ;;  %v1897_v50 = vld [vmem:[%s2294_s7 + $0xb0] sm:$0xff] }
  0x12   :  { %1441 = vmatprep.subr.mxu0 %v58_v15  ;;  %1478 = vmatpush3.msra.mxu1 %v39_v16  ;;  %v1903_v51 = vld [vmem:[%s2294_s7 + $0x30] sm:$0xff]  ;;  %v1909_v52 = vld [vmem:[%s2294_s7 + $0xa8] sm:$0xff]  ;;  %v1921_v54 = vld [vmem:[%s2294_s7 + $0xa0] sm:$0xff] }
  0x13   :  { %1442 = vmatpush3.msra.mxu0 %v58_v15  ;;  %1479 = vmatprep.mubr.msk.f32.mxu1 %vm152_vm0, %v35_v18  ;;  %v1915_v53 = vld [vmem:[%s2294_s7 + $0x28] sm:$0xff]  ;;  %v1927_v55 = vld [vmem:[%s2294_s7 + $0x20] sm:$0xff]  ;;  %v1933_v56 = vld [vmem:[%s2294_s7 + $0x98] sm:$0xff] }
  0x14   :  { %1443 = vmatprep.subr.mxu0 %v57_v17  ;;  %1480 = vmatmul.mubr.msk.f32.vlgmr.msra.gmra.mxu1 %vm152_vm0, %v36_v19  ;;  %v1939_v57 = vld [vmem:[%s2294_s7 + $0x18] sm:$0xff]  ;;  %v1945_v58 = vld [vmem:[%s2294_s7 + $0x90] sm:$0xff]  ;;  %v1955_v60 = vld [vmem:[%s2294_s7 + $0x88] sm:$0xff] }
  0x15   :  { %1444 = vmatpush3.msra.mxu0 %v57_v17  ;;  %1457 = vmatprep.mubr.f32.mxu0 %v47_v21  ;;  %v1950_v59 = vld [vmem:[%s2294_s7 + $0x10] sm:$0xff]  ;;  %v1961_v61 = vld [vmem:[%s2294_s7 + $0x8] sm:$0xff]  ;;  %v1967_v62 = vld [vmem:[%s2294_s7 + $0x80] sm:$0xff] }
  0x16   :  { %1445 = vmatprep.subr.mxu0 %v56_v20  ;;  %1482 = vmatprep.mubr.msk.f32.mxu1 %vm152_vm0, %v37_v22  ;;  %v1973_v63 = vld [vmem:[%s2294_s7] sm:$0xff]  ;;  %s1627_s7 = smov 8  }
  0x17   :  { %1446 = vmatpush3.msra.mxu0 %v56_v20  ;;  %1287 = vmatprep.subr.mxu1 %v1763_v24 }
  0x18   :  { %1447 = vmatprep.subr.mxu0 %v55_v23  ;;  %1483 = vmatmul.mubr.msk.f32.gmra.mxu1 %vm152_vm0, %v38_v25 }
  0x19   :  { %1448 = vmatpush3.msra.mxu0 %v55_v23  ;;  %1288 = vmatpush3.msra.mxu1 %v1775_v27 }
  0x1a   :  { %1449 = vmatprep.subr.mxu0 %v54_v26  ;;  %1289 = vmatprep.subr.mxu1 %v1801_v34 }
  0x1b   :  { %1450 = vmatpush3.msra.mxu0 %v54_v26  ;;  %1290 = vmatpush3.msra.mxu1 %v1806_v35 }
  0x1c   :  { %1451 = vmatprep.subr.mxu0 %v53_v28  ;;  %1291 = vmatprep.subr.mxu1 %v1813_v36 }
  0x1d   :  { %1452 = vmatpush3.msra.mxu0 %v53_v28  ;;  %1292 = vmatpush3.msra.mxu1 %v1819_v37 }
  0x1e   :  { %1453 = vmatprep.subr.mxu0 %v52_v29  ;;  %1293 = vmatprep.subr.mxu1 %v1825_v38 }
  0x1f   :  { %1454 = vmatpush3.msra.mxu0 %v52_v29  ;;  %1294 = vmatpush3.msra.mxu1 %v1831_v39 }
  0x20   :  { %1455 = vmatprep.subr.mxu0 %v51_v30  ;;  %1295 = vmatprep.subr.mxu1 %v1837_v40 }
  0x21   :  { %1456 = vmatpush3.msra.mxu0 %v51_v30  ;;  %1296 = vmatpush3.msra.mxu1 %v1843_v41 }
  0x22   :  { %1458 = vmatmul.mubr.f32.vlgmr.msra.gmra.mxu0 %v48_v31  ;;  %1297 = vmatprep.subr.mxu1 %v1849_v42 }
  0x23   :  { %1460 = vmatprep.mubr.f32.mxu0 %v49_v32  ;;  %1298 = vmatpush3.msra.mxu1 %v1855_v43 }
  0x24   :  { %1299 = vmatprep.subr.mxu1 %v1861_v44 }
  0x25   :  { %1300 = vmatpush3.msra.mxu1 %v1867_v45 }
  0x26   :  { %1461 = vmatmul.mubr.f32.gmra.mxu0 %v50_v33  ;;  %1301 = vmatprep.subr.mxu1 %v1873_v46 }
  0x27   :  { %1302 = vmatpush3.msra.mxu1 %v1879_v47 }
  0x28   :  { %1303 = vmatprep.subr.mxu1 %v1885_v48 }
  0x29   :  { %1304 = vmatpush3.msra.mxu1 %v1891_v49 }
  0x2a   :  { %1305 = vmatprep.subr.mxu1 %v1897_v50 }
  0x2b   :  { %1306 = vmatpush3.msra.mxu1 %v1903_v51 }
  0x2c   :  { %1307 = vmatprep.subr.mxu1 %v1909_v52 }
  0x2d   :  { %1308 = vmatpush3.msra.mxu1 %v1915_v53 }
  0x2e   :  { %1309 = vmatprep.subr.mxu1 %v1921_v54 }
  0x2f   :  { %1310 = vmatpush3.msra.mxu1 %v1927_v55 }
  0x30   :  { %1311 = vmatprep.subr.mxu1 %v1933_v56 }
  0x31   :  { %1312 = vmatpush3.msra.mxu1 %v1939_v57 }
  0x32   :  { %1313 = vmatprep.subr.mxu1 %v1945_v58 }
  0x33   :  { %1314 = vmatpush3.msra.mxu1 %v1950_v59 }
  0x34   :  { %1315 = vmatprep.subr.mxu1 %v1955_v60 }
  0x35   :  { %1316 = vmatpush3.msra.mxu1 %v1961_v61 }
  0x36   :  { %1317 = vmatprep.subr.mxu1 %v1967_v62 }
  0x37   :  { %1318 = vmatpush3.msra.mxu1 %v1973_v63 }
  0xd4   :  { %v1481_v0 = vpop.f32.mrf.mxu1 }
  0xd6   :  { %v231_v1 = vpop.f32.mrf.mxu1 }
  0xd8   :  { %v1484_v4 = vpop.f32.mrf.mxu1 }
  0xda   :  { %v241_v9 = vpop.f32.mrf.mxu1 }
  0xe2   :  { %v1459_v2 = vpop.f32.mrf.mxu0 }
  0xe3   :  { %v1978_v5 = vadd.f32 %v1481_v0, %v1459_v2 }
  0xe4   :  { %v133_v3 = vpop.f32.mrf.mxu0 }
  0xe5   :  { %v1980_v6 = vadd.f32 %v231_v1, %v133_v3  ;;  %v295_v11 = vmul.f32 %v1978_v5, %v1978_v5 }
  0xe6   :  { %v1462_v7 = vpop.f32.mrf.mxu0 }
  0xe7   :  { %v294_v8 = vmul.f32 %v1980_v6, %v1980_v6  ;;  %v285_v12 = vadd.f32 %v1978_v5, %v1980_v6  ;;  %v1988_v13 = vadd.f32 %v1484_v4, %v1462_v7 }
  0xe8   :  { %v143_v10 = vpop.f32.mrf.mxu0 }
  0xe9   :  { %v1990_v14 = vadd.f32 %v241_v9, %v143_v10  ;;  %v298_v15 = vadd.f32 %v295_v11, %v294_v8  ;;  %v297_v18 = vmul.f32 %v1988_v13, %v1988_v13  ;;  %v1628_v9 = vmov 0.0   ;;  %v2003_v10 = vld [vmem:[%s2295_s8] sm:$0xff] }
  0xea   :  { %1485 = vmatprep.subr.mxu0 %v1628_v9  ;;  %1487 = vmatprep.mubr.msk.f32.mxu0 %vm1629_vm1, %v1628_v9 }
  0xeb   :  { %v286_v16 = vadd.f32 %v285_v12, %v1990_v14  ;;  %v296_v17 = vmul.f32 %v1990_v14, %v1990_v14  ;;  %1486 = vmatpush3.msra.mxu0 %v2003_v10 }
  0xec   :  { %1490 = vmatprep.subr.mxu0 %v1628_v9 }
  0xed   :  { %v287_v19 = vadd.f32 %v286_v16, %v1988_v13  ;;  %v299_v20 = vadd.f32 %v298_v15, %v296_v17  ;;  %v663_v16 = vld [vmem:[%s2296_s4 + $0x78] sm:$0xff] }
  0xee   :  { %1533 = vmatprep.subr.mxu1 %v663_v16 }
  0xef   :  { %v288_v21 = vrot.slane %v287_v19, 4  ;;  %v300_v22 = vadd.f32 %v299_v20, %v297_v18  ;;  %v662_v18 = vld [vmem:[%s2296_s4 + $0x70] sm:$0xff]  ;;  %v660_v20 = vld [vmem:[%s2296_s4 + $0x60] sm:$0xff] }
  0xf1   :  { %v289_v23 = vadd.f32 %v288_v21, %v287_v19  ;;  %v301_v25 = vrot.slane %v300_v22, 4  ;;  %v661_v19 = vld [vmem:[%s2296_s4 + $0x68] sm:$0xff]  ;;  %v659_v21 = vld [vmem:[%s2296_s4 + $0x58] sm:$0xff] }
  0xf3   :  { %v290_v26 = vrot.slane %v289_v23, 2  ;;  %v302_v28 = vadd.f32 %v301_v25, %v300_v22  ;;  %v658_v22 = vld [vmem:[%s2296_s4 + $0x50] sm:$0xff]  ;;  %v656_v25 = vld [vmem:[%s2296_s4 + $0x40] sm:$0xff] }
  0xf5   :  { %v291_v29 = vadd.f32 %v290_v26, %v289_v23  ;;  %v303_v30 = vrot.slane %v302_v28, 2  ;;  %v657_v23 = vld [vmem:[%s2296_s4 + $0x48] sm:$0xff]  ;;  %v655_v26 = vld [vmem:[%s2296_s4 + $0x38] sm:$0xff] }
  0xf7   :  { %v304_v31 = vadd.f32 %v303_v30, %v302_v28  ;;  %v292_v32 = vrot.slane %v291_v29, 1  ;;  %v283_v28 = vld [vmem:[%s2297_s9] sm:$0x1] }
  0xf9   :  { %v305_v33 = vrot.slane %v304_v31, 1  ;;  %v293_v1 = vadd.f32 %v292_v32, %v291_v29  ;;  %v679_v32 = vld [vmem:[%s2298_s5 + $0x78] sm:$0xff] }
  0xfb   :  { %v306_v0 = vadd.f32 %v305_v33, %v304_v31  ;;  %v284_v31 = vld [vmem:[%s2297_s9 + $0x1] sm:$0x1] }
  0xfd   :  { %371 = vmatprep.mubr.f32.mxu1 %v306_v0 }
  0xfe   :  { %372 = vmatmul.mubr.f32.vlgmr.msra.gmra.mxu1 %v293_v1  ;;  %v678_v1 = vld [vmem:[%s2298_s5 + $0x70] sm:$0xff] }
  0xff   :  { %1534 = vmatpush3.msra.mxu1 %v663_v16  ;;  %v669_v16 = vld [vmem:[%s2298_s5 + $0x28] sm:$0xff] }
 0x100   :  { %1535 = vmatprep.subr.mxu1 %v662_v18 }
 0x101   :  { %1536 = vmatpush3.msra.mxu1 %v662_v18  ;;  %v654_v18 = vld [vmem:[%s2296_s4 + $0x30] sm:$0xff] }
 0x102   :  { %1537 = vmatprep.subr.mxu1 %v661_v19 }
 0x103   :  { %1538 = vmatpush3.msra.mxu1 %v661_v19  ;;  %v667_v19 = vld [vmem:[%s2298_s5 + $0x18] sm:$0xff] }
 0x104   :  { %1539 = vmatprep.subr.mxu1 %v660_v20 }
 0x105   :  { %1540 = vmatpush3.msra.mxu1 %v660_v20  ;;  %v653_v20 = vld [vmem:[%s2296_s4 + $0x28] sm:$0xff] }
 0x106   :  { %1541 = vmatprep.subr.mxu1 %v659_v21 }
 0x107   :  { %1542 = vmatpush3.msra.mxu1 %v659_v21  ;;  %v666_v21 = vld [vmem:[%s2298_s5 + $0x10] sm:$0xff] }
 0x108   :  { %1543 = vmatprep.subr.mxu1 %v658_v22 }
 0x109   :  { %1544 = vmatpush3.msra.mxu1 %v658_v22  ;;  %v652_v22 = vld [vmem:[%s2296_s4 + $0x20] sm:$0xff] }
 0x10a   :  { %1545 = vmatprep.subr.mxu1 %v657_v23 }
 0x10b   :  { %1546 = vmatpush3.msra.mxu1 %v657_v23  ;;  %v665_v23 = vld [vmem:[%s2298_s5 + $0x8] sm:$0xff] }
 0x10c   :  { %1547 = vmatprep.subr.mxu1 %v656_v25 }
 0x10d   :  { %1548 = vmatpush3.msra.mxu1 %v656_v25  ;;  %v651_v25 = vld [vmem:[%s2296_s4 + $0x18] sm:$0xff] }
 0x10e   :  { %1549 = vmatprep.subr.mxu1 %v655_v26 }
 0x10f   :  { %1550 = vmatpush3.msra.mxu1 %v655_v26  ;;  %v664_v26 = vld [vmem:[%s2298_s5] sm:$0xff] }
 0x110   :  { %1551 = vmatprep.subr.mxu1 %v654_v18 }
 0x111   :  { %1552 = vmatpush3.msra.mxu1 %v654_v18 }
 0x112   :  { %1553 = vmatprep.subr.mxu1 %v653_v20 }
 0x113   :  { %1554 = vmatpush3.msra.mxu1 %v653_v20 }
 0x114   :  { %1555 = vmatprep.subr.mxu1 %v652_v22 }
 0x115   :  { %1556 = vmatpush3.msra.mxu1 %v652_v22 }
 0x116   :  { %1557 = vmatprep.subr.mxu1 %v651_v25 }
 0x117   :  { %1558 = vmatpush3.msra.mxu1 %v651_v25 }
 0x1be   :  { %v1319_v2 = vpop.f32.mrf.mxu1 }
 0x1c0   :  { %v1320_v3 = vpop.f32.mrf.mxu1 }
 0x1c1   :  { %v1321_v4 = vadd.f32 %v1320_v3, %v1319_v2  ;;  %v677_v2 = vld [vmem:[%s2298_s5 + $0x68] sm:$0xff]  ;;  %v676_v3 = vld [vmem:[%s2298_s5 + $0x60] sm:$0xff] }
 0x1c3   :  { %v378_v7 = vmul.f32 0.001953125, %v1321_v4  ;;  %v675_v4 = vld [vmem:[%s2298_s5 + $0x58] sm:$0xff] }
 0x1c5   :  { %v379_v8 = vmul.f32 %v378_v7, %v378_v7 }
 0x1c7   :  { %381 = vrot.lane.b32.xlu0 %v379_v8, %s1627_s7  ;;  %v673_v8 = vld [vmem:[%s2298_s5 + $0x48] sm:$0xff] }
 0x239   :  { %v382_v11 = vpop.permute.xlu0 %381 }
 0x23a   :  { %v384_v12 = vsub.f32 %v378_v7, %v382_v11  ;;  %v672_v11 = vld [vmem:[%s2298_s5 + $0x40] sm:$0xff] }
 0x23c   :  { %v385_v15 = vadd.f32 1e-05, %v384_v12  ;;  %v671_v12 = vld [vmem:[%s2298_s5 + $0x38] sm:$0xff] }
 0x23e   :  { %1623 = vrsqrt.f32 %v385_v15  ;;  %v670_v15 = vld [vmem:[%s2298_s5 + $0x30] sm:$0xff] }
 0x24b   :  { %v1624_v17 = vpop.eup %1623 }
 0x24c   :  { %388 = vrot.lane.b32.xlu0 %v1624_v17, %s1630_s12  ;;  %v668_v17 = vld [vmem:[%s2298_s5 + $0x20] sm:$0xff] }
 0x2be   :  { %v389_v29 = vpop.permute.xlu0 %388 }
 0x2bf   :  { %v391_v30 = vmul.f32 %v389_v29, %v283_v28  ;;  %v650_v28 = vld [vmem:[%s2296_s4 + $0x10] sm:$0xff]  ;;  %v649_v29 = vld [vmem:[%s2296_s4 + $0x8] sm:$0xff] }
 0x2c0   :  { %1559 = vmatprep.subr.mxu1 %v650_v28 }
 0x2c1   :  { %v392_v33 = vmul.f32 %v391_v30, %v378_v7  ;;  %1488 = vmatmul.mubr.msk.f32.vlgmr.msra.gmra.mxu0 %vm394_vm2, %v391_v30  ;;  %v674_v7 = vld [vmem:[%s2298_s5 + $0x50] sm:$0xff]  ;;  %1560 = vmatpush3.msra.mxu1 %v650_v28  ;;  %v865_v30 = vld [vmem:[%s2299_s6 + $0x78] sm:$0xff] }
 0x2c2   :  { %1491 = vmatpush3.msra.mxu0 %v2003_v10  ;;  %1492 = vmatprep.mubr.msk.f32.mxu0 %vm1629_vm1, %v1628_v9 }
 0x2c3   :  { %v393_v0 = vsub.f32 %v284_v31, %v392_v33  ;;  %1495 = vmatprep.subr.mxu0 %v679_v32  ;;  %1561 = vmatprep.subr.mxu1 %v649_v29  ;;  %v648_v31 = vld [vmem:[%s2296_s4] sm:$0xff] }
 0x2c4   :  { %1562 = vmatpush3.msra.mxu1 %v649_v29 }
 0x2c5   :  { %1493 = vmatmul.mubr.msk.f32.vlgmr.msra.gmra.mxu0 %vm394_vm2, %v393_v0  ;;  %1563 = vmatprep.subr.mxu1 %v648_v31 }
 0x2c6   :  { %1496 = vmatpush3.msra.mxu0 %v679_v32  ;;  %1564 = vmatpush3.msra.mxu1 %v648_v31  ;;  %v541_v32 = vlaneseq }
 0x2c7   :  { %1497 = vmatprep.subr.mxu0 %v678_v1  ;;  %1386 = vmatprep.subr.mxu1 %v1763_v24 }
 0x2c8   :  { %1498 = vmatpush3.msra.mxu0 %v678_v1  ;;  %v2121_v33 = vshrl.u32 %v541_v32, 7 }
 0x2c9   :  { %1499 = vmatprep.subr.mxu0 %v677_v2 }
 0x2ca   :  { %1500 = vmatpush3.msra.mxu0 %v677_v2  ;;  %v2124_v0 = vsub.s32 0, %v2121_v33  ;;  %vm622_vm3 = vcmp.lt.s32.totalorder %v2121_v33, 1  ;;  %vm639_vm6 = vcmp.lt.s32.totalorder %v2121_v33, 7 }
 0x2cb   :  { %1501 = vmatprep.subr.mxu0 %v676_v3 }
 0x2cc   :  { %1502 = vmatpush3.msra.mxu0 %v676_v3 }
 0x2cd   :  { %1503 = vmatprep.subr.mxu0 %v675_v4 }
 0x2ce   :  { %1504 = vmatpush3.msra.mxu0 %v675_v4 }
 0x2cf   :  { %1505 = vmatprep.subr.mxu0 %v674_v7 }
 0x2d0   :  { %1506 = vmatpush3.msra.mxu0 %v674_v7 }
 0x2d1   :  { %1507 = vmatprep.subr.mxu0 %v673_v8 }
 0x2d2   :  { %1508 = vmatpush3.msra.mxu0 %v673_v8 }
 0x2d3   :  { %1509 = vmatprep.subr.mxu0 %v672_v11 }
 0x2d4   :  { %1510 = vmatpush3.msra.mxu0 %v672_v11 }
 0x2d5   :  { %1511 = vmatprep.subr.mxu0 %v671_v12 }
 0x2d6   :  { %1512 = vmatpush3.msra.mxu0 %v671_v12 }
 0x2d7   :  { %1513 = vmatprep.subr.mxu0 %v670_v15 }
 0x2d8   :  { %1514 = vmatpush3.msra.mxu0 %v670_v15 }
 0x2d9   :  { %1515 = vmatprep.subr.mxu0 %v669_v16 }
 0x2da   :  { %1516 = vmatpush3.msra.mxu0 %v669_v16  ;;  %v570_v16 = vand.u32 15, %v2121_v33 }
 0x2db   :  { %1517 = vmatprep.subr.mxu0 %v668_v17 }
 0x2dc   :  { %1518 = vmatpush3.msra.mxu0 %v668_v17  ;;  %v564_v17 = vadd.s32 16, %v2121_v33  ;;  %vm1251_vm4 = vcmp.ne.s32.totalorder %v570_v16, 0 }
 0x2dd   :  { %1519 = vmatprep.subr.mxu0 %v667_v19 }
 0x2de   :  { %1520 = vmatpush3.msra.mxu0 %v667_v19 }
 0x2df   :  { %1521 = vmatprep.subr.mxu0 %v666_v21 }
 0x2e0   :  { %1522 = vmatpush3.msra.mxu0 %v666_v21 }
 0x2e1   :  { %1523 = vmatprep.subr.mxu0 %v665_v23 }
 0x2e2   :  { %1524 = vmatpush3.msra.mxu0 %v665_v23 }
 0x2e3   :  { %1525 = vmatprep.subr.mxu0 %v664_v26 }
 0x2e4   :  { %1526 = vmatpush3.msra.mxu0 %v664_v26 }
 0x2e5   :  { %1571 = vmatprep.subr.mxu0 %v865_v30 }
 0x381   :  { %v464_v1 = vpop.f32.mrf.mxu0 }
 0x382   :  { %v544_v2 = vrot.slane %v464_v1, %v2124_v0  ;;  %v863_v1 = vld [vmem:[%s2299_s6 + $0x68] sm:$0xff] }
 0x383   :  { %v1489_v3 = vpop.f32.mrf.mxu0 }
 0x384   :  { %v546_v4 = vmul.f32 %v544_v2, %v1978_v5  ;;  %v548_v8 = vmul.f32 %v544_v2, %v1988_v13  ;;  %v545_v12 = vmul.f32 %v544_v2, %v1980_v6  ;;  %v547_v24 = vmul.f32 %v544_v2, %v1990_v14  ;;  %v864_v14 = vld [vmem:[%s2299_s6 + $0x70] sm:$0xff] }
 0x385   :  { %v537_v7 = vpop.f32.mrf.mxu0  ;;  %v584_v6 = vand.u32 15, %v564_v17 }
 0x386   :  { %v552_v11 = vrot.slane %v537_v7, %v2124_v0 }
 0x387   :  { %v1494_v15 = vpop.f32.mrf.mxu0  ;;  %vm1252_vm5 = vcmp.ne.s32.totalorder %v584_v6, 0 }
 0x388   :  { %v556_v18 = vadd.f32 %v552_v11, %v548_v8  ;;  %v553_v19 = vadd.f32 %v552_v11, %v545_v12  ;;  %v554_v20 = vadd.f32 %v552_v11, %v546_v4  ;;  %v555_v21 = vadd.f32 %v552_v11, %v547_v24  ;;  %v861_v8 = vld [vmem:[%s2299_s6 + $0x58] sm:$0xff]  ;;  %v860_v12 = vld [vmem:[%s2299_s6 + $0x50] sm:$0xff]  ;;  %v859_v24 = vld [vmem:[%s2299_s6 + $0x48] sm:$0xff] }
 0x389   :  { %v858_v15 = vld [vmem:[%s2299_s6 + $0x40] sm:$0xff] }
 0x38a   :  { %v2134_v22 = vmax.f32 %v556_v18, 0.0  ;;  %v2136_v5 = vmax.f32 %v553_v19, 0.0  ;;  %v2138_v13 = vmax.f32 %v554_v20, 0.0  ;;  %v2140_v23 = vmax.f32 %v555_v21, 0.0 }
 0x38c   :  { %1527 = vmatprep.mubr.f32.mxu0 %v2136_v5  ;;  %v618_v25 = vrot.slane %v2136_v5, 7  ;;  %v621_v26 = vrot.slane %v2134_v22, 7  ;;  %v619_v28 = vrot.slane %v2138_v13, 7  ;;  %v620_v29 = vrot.slane %v2140_v23, 7 }
 0x38d   :  { %1528 = vmatmul.mubr.f32.vlgmr.msra.gmra.mxu0 %v2138_v13  ;;  %v635_v2 = vrot.slane %v2136_v5, 1  ;;  %v636_v3 = vrot.slane %v2138_v13, 1 }
 0x38e   :  { %1572 = vmatpush3.msra.mxu0 %v865_v30  ;;  %1530 = vmatprep.mubr.f32.mxu0 %v2140_v23  ;;  %v626_v31 = vsel %vm622_vm3, %v621_v26, %v618_v25  ;;  %v625_v32 = vsel %vm622_vm3, %v618_v25, %v619_v28  ;;  %v862_v30 = vld [vmem:[%s2299_s6 + $0x60] sm:$0xff]  ;;  %v624_v4 = vsel %vm622_vm3, %v619_v28, %v620_v29 }
 0x38f   :  { %1573 = vmatprep.subr.mxu0 %v864_v14  ;;  %1565 = vmatprep.mubr.msk.f32.mxu1 %vm1251_vm4, %v626_v31  ;;  %v642_v7 = vsel %vm639_vm6, %v635_v2, %v636_v3  ;;  %v623_v11 = vsel %vm622_vm3, %v620_v29, %v621_v26 }
 0x390   :  { %1574 = vmatpush3.msra.mxu0 %v864_v14  ;;  %1566 = vmatmul.mubr.f32.vlgmr.msra.gmra.mxu1 %v625_v32 }
 0x391   :  { %1575 = vmatprep.subr.mxu0 %v863_v1  ;;  %1531 = vmatmul.mubr.f32.gmra.mxu0 %v2134_v22 }
 0x392   :  { %1568 = vmatprep.mubr.msk.f32.mxu1 %vm1252_vm5, %v624_v4  ;;  %1576 = vmatpush3.msra.mxu0 %v863_v1 }
 0x393   :  { %1577 = vmatprep.subr.mxu0 %v862_v30  ;;  %1603 = vmatprep.mubr.f32.mxu0 %v642_v7 }
 0x394   :  { %1578 = vmatpush3.msra.mxu0 %v862_v30  ;;  %1569 = vmatmul.mubr.f32.gmra.mxu1 %v623_v11 }
 0x395   :  { %1579 = vmatprep.subr.mxu0 %v861_v8  ;;  %1387 = vmatpush3.msra.mxu1 %v1775_v27  ;;  %v857_v27 = vld [vmem:[%s2299_s6 + $0x38] sm:$0xff] }
 0x396   :  { %1580 = vmatpush3.msra.mxu0 %v861_v8  ;;  %1388 = vmatprep.subr.mxu1 %v1801_v34  ;;  %v856_v34 = vld [vmem:[%s2299_s6 + $0x30] sm:$0xff] }
 0x397   :  { %1581 = vmatprep.subr.mxu0 %v860_v12  ;;  %1389 = vmatpush3.msra.mxu1 %v1806_v35  ;;  %v855_v35 = vld [vmem:[%s2299_s6 + $0x28] sm:$0xff] }
 0x398   :  { %1582 = vmatpush3.msra.mxu0 %v860_v12  ;;  %1390 = vmatprep.subr.mxu1 %v1813_v36  ;;  %v854_v36 = vld [vmem:[%s2299_s6 + $0x20] sm:$0xff] }
 0x399   :  { %1583 = vmatprep.subr.mxu0 %v859_v24  ;;  %1391 = vmatpush3.msra.mxu1 %v1819_v37  ;;  %v853_v37 = vld [vmem:[%s2299_s6 + $0x18] sm:$0xff] }
 0x39a   :  { %1584 = vmatpush3.msra.mxu0 %v859_v24  ;;  %1392 = vmatprep.subr.mxu1 %v1825_v38  ;;  %v563_v38 = vadd.s32 8, %v2121_v33 }
 0x39b   :  { %1585 = vmatprep.subr.mxu0 %v858_v15  ;;  %1393 = vmatpush3.msra.mxu1 %v1831_v39  ;;  %v852_v39 = vld [vmem:[%s2299_s6 + $0x10] sm:$0xff] }
 0x39c   :  { %1586 = vmatpush3.msra.mxu0 %v858_v15  ;;  %1394 = vmatprep.subr.mxu1 %v1837_v40  ;;  %v851_v40 = vld [vmem:[%s2299_s6 + $0x8] sm:$0xff] }
 0x39d   :  { %1587 = vmatprep.subr.mxu0 %v857_v27  ;;  %1395 = vmatpush3.msra.mxu1 %v1843_v41  ;;  %v577_v41 = vand.u32 15, %v563_v38 }
 0x39e   :  { %1588 = vmatpush3.msra.mxu0 %v857_v27  ;;  %1396 = vmatprep.subr.mxu1 %v1849_v42  ;;  %v565_v42 = vadd.s32 24, %v2121_v33 }
 0x39f   :  { %1589 = vmatprep.subr.mxu0 %v856_v34  ;;  %1397 = vmatpush3.msra.mxu1 %v1855_v43  ;;  %v637_v43 = vrot.slane %v2140_v23, 1  ;;  %vm1253_vm7 = vcmp.ne.s32.totalorder %v577_v41, 15  ;;  %v956_v41 = vld [vmem:[%s2297_s9 + $0x3] sm:$0x1] }
 0x3a0   :  { %1590 = vmatpush3.msra.mxu0 %v856_v34  ;;  %1398 = vmatprep.subr.mxu1 %v1861_v44  ;;  %v850_v44 = vld [vmem:[%s2299_s6] sm:$0xff] }
 0x3a1   :  { %1591 = vmatprep.subr.mxu0 %v855_v35  ;;  %1399 = vmatpush3.msra.mxu1 %v1867_v45  ;;  %v638_v45 = vrot.slane %v2134_v22, 1 }
 0x3a2   :  { %1592 = vmatpush3.msra.mxu0 %v855_v35  ;;  %1400 = vmatprep.subr.mxu1 %v1873_v46  ;;  %v591_v46 = vand.u32 15, %v565_v42 }
 0x3a3   :  { %1593 = vmatprep.subr.mxu0 %v854_v36  ;;  %1401 = vmatpush3.msra.mxu1 %v1879_v47  ;;  %v641_v47 = vsel %vm639_vm6, %v636_v3, %v637_v43 }
 0x3a4   :  { %1594 = vmatpush3.msra.mxu0 %v854_v36  ;;  %1402 = vmatprep.subr.mxu1 %v1885_v48  ;;  %v640_v48 = vsel %vm639_vm6, %v637_v43, %v638_v45  ;;  %vm1254_vm8 = vcmp.ne.s32.totalorder %v591_v46, 15 }
 0x3a5   :  { %1595 = vmatprep.subr.mxu0 %v853_v37  ;;  %1403 = vmatpush3.msra.mxu1 %v1891_v49  ;;  %v643_v49 = vsel %vm639_vm6, %v638_v45, %v635_v2 }
 0x3a6   :  { %1596 = vmatpush3.msra.mxu0 %v853_v37  ;;  %1404 = vmatprep.subr.mxu1 %v1897_v50 }
 0x3a7   :  { %1597 = vmatprep.subr.mxu0 %v852_v39  ;;  %1405 = vmatpush3.msra.mxu1 %v1903_v51 }
 0x3a8   :  { %1598 = vmatpush3.msra.mxu0 %v852_v39  ;;  %1406 = vmatprep.subr.mxu1 %v1909_v52 }
 0x3a9   :  { %1599 = vmatprep.subr.mxu0 %v851_v40  ;;  %1407 = vmatpush3.msra.mxu1 %v1915_v53 }
 0x3aa   :  { %1600 = vmatpush3.msra.mxu0 %v851_v40  ;;  %1408 = vmatprep.subr.mxu1 %v1921_v54 }
 0x3ab   :  { %1601 = vmatprep.subr.mxu0 %v850_v44  ;;  %1409 = vmatpush3.msra.mxu1 %v1927_v55 }
 0x3ac   :  { %1602 = vmatpush3.msra.mxu0 %v850_v44  ;;  %1410 = vmatprep.subr.mxu1 %v1933_v56 }
 0x3ad   :  { %1604 = vmatmul.mubr.msk.f32.vlgmr.msra.gmra.mxu0 %vm1253_vm7, %v641_v47  ;;  %1411 = vmatpush3.msra.mxu1 %v1939_v57 }
 0x3ae   :  { %1606 = vmatprep.mubr.f32.mxu0 %v640_v48  ;;  %1412 = vmatprep.subr.mxu1 %v1945_v58 }
 0x3af   :  { %1413 = vmatpush3.msra.mxu1 %v1950_v59  ;;  %1609 = vmatprep.subr.mxu0 %v1628_v9 }
 0x3b0   :  { %1414 = vmatprep.subr.mxu1 %v1955_v60  ;;  %1610 = vmatpush3.msra.mxu0 %v2003_v10 }
 0x3b1   :  { %1607 = vmatmul.mubr.msk.f32.gmra.mxu0 %vm1254_vm8, %v643_v49  ;;  %1415 = vmatpush3.msra.mxu1 %v1961_v61 }
 0x3b2   :  { %1416 = vmatprep.subr.mxu1 %v1967_v62  ;;  %1611 = vmatprep.mubr.msk.f32.mxu0 %vm1629_vm1, %v1628_v9 }
 0x3b3   :  { %1417 = vmatpush3.msra.mxu1 %v1973_v63 }
 0x3b4   :  { %1614 = vmatprep.subr.mxu1 %v1628_v9 }
 0x44d   :  { %v1529_v50 = vpop.f32.mrf.mxu0 }
 0x44f   :  { %v746_v51 = vpop.f32.mrf.mxu0 }
 0x450   :  { %v1567_v52 = vpop.f32.mrf.mxu1 }
 0x451   :  { %v1532_v53 = vpop.f32.mrf.mxu0  ;;  %v837_v58 = vadd.f32 %v1567_v52, %v1529_v50 }
 0x452   :  { %v831_v54 = vpop.f32.mrf.mxu1 }
 0x453   :  { %v756_v55 = vpop.f32.mrf.mxu0  ;;  %v832_v59 = vadd.f32 %v831_v54, %v746_v51 }
 0x454   :  { %v1570_v56 = vpop.f32.mrf.mxu1 }
 0x455   :  { %v847_v17 = vadd.f32 %v1570_v56, %v1532_v53 }
 0x456   :  { %v841_v60 = vpop.f32.mrf.mxu1 }
 0x457   :  { %v842_v18 = vadd.f32 %v841_v60, %v756_v55 }
 0x46d   :  { %v1605_v57 = vpop.f32.mrf.mxu0 }
 0x46e   :  { %v952_v62 = vadd.f32 %v1605_v57, %v837_v58 }
 0x46f   :  { %v932_v61 = vpop.f32.mrf.mxu0 }
 0x470   :  { %v951_v33 = vadd.f32 %v932_v61, %v832_v59  ;;  %v967_v20 = vmul.f32 %v952_v62, %v952_v62 }
 0x471   :  { %v1608_v16 = vpop.f32.mrf.mxu0 }
 0x472   :  { %v966_v63 = vmul.f32 %v951_v33, %v951_v33  ;;  %v957_v21 = vadd.f32 %v952_v62, %v951_v33  ;;  %v954_v22 = vadd.f32 %v1608_v16, %v847_v17 }
 0x473   :  { %v942_v19 = vpop.f32.mrf.mxu0 }
 0x474   :  { %v953_v5 = vadd.f32 %v942_v19, %v842_v18  ;;  %v970_v13 = vadd.f32 %v967_v20, %v966_v63  ;;  %v969_v14 = vmul.f32 %v954_v22, %v954_v22 }
 0x476   :  { %v958_v23 = vadd.f32 %v957_v21, %v953_v5  ;;  %v968_v6 = vmul.f32 %v953_v5, %v953_v5 }
 0x478   :  { %v959_v25 = vadd.f32 %v958_v23, %v954_v22  ;;  %v971_v26 = vadd.f32 %v970_v13, %v968_v6 }
 0x47a   :  { %v960_v28 = vrot.slane %v959_v25, 4  ;;  %v972_v29 = vadd.f32 %v971_v26, %v969_v14 }
 0x47c   :  { %v961_v31 = vadd.f32 %v960_v28, %v959_v25  ;;  %v973_v32 = vrot.slane %v972_v29, 4 }
 0x47e   :  { %v962_v1 = vrot.slane %v961_v31, 2  ;;  %v974_v2 = vadd.f32 %v973_v32, %v972_v29 }
 0x480   :  { %v963_v3 = vadd.f32 %v962_v1, %v961_v31  ;;  %v975_v30 = vrot.slane %v974_v2, 2 }
 0x482   :  { %v976_v4 = vadd.f32 %v975_v30, %v974_v2  ;;  %v964_v7 = vrot.slane %v963_v3, 1 }
 0x484   :  { %v977_v8 = vrot.slane %v976_v4, 1  ;;  %v965_v12 = vadd.f32 %v964_v7, %v963_v3 }
 0x486   :  { %v978_v11 = vadd.f32 %v977_v8, %v976_v4 }
 0x488   :  { %1043 = vmatprep.mubr.f32.mxu1 %v978_v11 }
 0x489   :  { %1044 = vmatmul.mubr.f32.vlgmr.msra.gmra.mxu1 %v965_v12 }
 0x48a   :  { %1615 = vmatpush3.msra.mxu1 %v2003_v10  ;;  %1616 = vmatprep.mubr.msk.f32.mxu1 %vm1629_vm1, %v1628_v9  ;;  %v955_v10 = vld [vmem:[%s2297_s9 + $0x2] sm:$0x1] }
 0x549   :  { %v1418_v24 = vpop.f32.mrf.mxu1 }
 0x54b   :  { %v1419_v15 = vpop.f32.mrf.mxu1 }
 0x54c   :  { %v1420_v27 = vadd.f32 %v1419_v15, %v1418_v24 }
 0x54e   :  { %v1049_v34 = vmul.f32 0.001953125, %v1420_v27 }
 0x550   :  { %v1050_v35 = vmul.f32 %v1049_v34, %v1049_v34 }
 0x552   :  { %1052 = vrot.lane.b32.xlu1 %v1050_v35, %s1627_s7 }
 0x5c4   :  { %v1053_v36 = vpop.permute.xlu1 %1052 }
 0x5c5   :  { %v1055_v37 = vsub.f32 %v1049_v34, %v1053_v36 }
 0x5c7   :  { %v1056_v38 = vadd.f32 1e-05, %v1055_v37 }
 0x5c9   :  { %1625 = vrsqrt.f32 %v1056_v38 }
 0x5d6   :  { %v1626_v39 = vpop.eup %1625 }
 0x5d7   :  { %1059 = vrot.lane.b32.xlu1 %v1626_v39, %s1630_s12 }
 0x649   :  { %v1060_v40 = vpop.permute.xlu1 %1059 }
 0x64a   :  { %v1062_v9 = vmul.f32 %v1060_v40, %v955_v10 }
 0x64c   :  { %v1063_v42 = vmul.f32 %v1062_v9, %v1049_v34  ;;  %1612 = vmatmul.mubr.msk.f32.vlgmr.msra.gmra.mxu0 %vm394_vm2, %v1062_v9 }
 0x64e   :  { %v1064_v43 = vsub.f32 %v956_v41, %v1063_v42 }
 0x650   :  { %1617 = vmatmul.mubr.msk.f32.vlgmr.msra.gmra.mxu1 %vm394_vm2, %v1064_v43 }
 0x70c   :  { %v1134_v44 = vpop.f32.mrf.mxu0 }
 0x70d   :  { %v1214_v45 = vrot.slane %v1134_v44, %v2124_v0 }
 0x70e   :  { %v1613_v46 = vpop.f32.mrf.mxu0 }
 0x70f   :  { %v1215_v47 = vmul.f32 %v1214_v45, %v951_v33  ;;  %v1216_v49 = vmul.f32 %v1214_v45, %v952_v62  ;;  %v1217_v50 = vmul.f32 %v1214_v45, %v953_v5  ;;  %v1218_v51 = vmul.f32 %v1214_v45, %v954_v22 }
 0x710   :  { %v1207_v48 = vpop.f32.mrf.mxu1 }
 0x711   :  { %v1222_v52 = vrot.slane %v1207_v48, %v2124_v0 }
 0x712   :  { %v1618_v53 = vpop.f32.mrf.mxu1 }
 0x713   :  { %v1223_v54 = vadd.f32 %v1222_v52, %v1215_v47  ;;  %v1224_v55 = vadd.f32 %v1222_v52, %v1216_v49  ;;  %v1225_v56 = vadd.f32 %v1222_v52, %v1217_v50  ;;  %v1226_v57 = vadd.f32 %v1222_v52, %v1218_v51 }
 0x715   :  { %1227 = vst [vmem:[%s2300_s10] sm:$0xff] %v1223_v54  ;;  %1228 = vst [vmem:[%s2300_s10 + $0x8] sm:$0xff] %v1224_v55 }
 0x716   :  { %1229 = vst [vmem:[%s2300_s10 + $0x10] sm:$0xff] %v1225_v56  ;;  %1230 = vst [vmem:[%s2300_s10 + $0x18] sm:$0xff] %v1226_v57 }

</bundles_post_ra>
